<compile_context>
chip_gen: v5e
topology: v5e:2x2
jax: 0.10.0
libtpu: 0.0.40
codegen_flags: <defaults>
</compile_context>

<pallas_src>
import jax
import jax.numpy as jnp
from jax.experimental import pallas as pl
from jax.experimental.pallas import tpu as pltpu

_LANES = 128
_MAX_TILE_ROWS = 4096          # 4096 x 128 f32 = 2 MiB per pipeline buffer
_VMEM_LIMIT_BYTES = 48 * 1024 * 1024  # fits v7x 64 MiB physical with headroom


def _affine_kernel(sm_ref, x_ref, y_ref, rx_ref, ry_ref):
    # sm_ref: SMEM (2,) f32 -> [scale, mean]; data refs: lane-dense VMEM tiles.
    s = sm_ref[0]
    m = sm_ref[1]
    rx_ref[...] = (x_ref[...].astype(jnp.float32) * s + m).astype(rx_ref.dtype)
    ry_ref[...] = (y_ref[...].astype(jnp.float32) * s + m).astype(ry_ref.dtype)


def _pick_block_rows(rows: int) -> int:
    """Choose block rows: big blocks for large inputs, >=2 blocks for v7x."""
    if rows > _MAX_TILE_ROWS:
        return _MAX_TILE_ROWS
    if rows >= 16:
        # Split into at least 2 sublane-aligned blocks so v7x's two
        # TensorCores both get work (harmless serial loop on v5e/v6e).
        return pl.cdiv(pl.cdiv(rows, 2), 8) * 8
    # Tiny input: single block equal to the full row extent (allowed even if
    # not a multiple of 8 because it equals the full array dim).
    return rows


def output_standardize_transform(outputs, targets, extra_params):
    """JAX/Pallas equivalent of OutputStandardizeTransform.forward."""
    assert outputs.shape == targets.shape, "outputs/targets must match in shape"
    dtype = outputs.dtype

    # Affine constants kept in f32 (precision + v5e scalar-path friendliness).
    scales = jnp.asarray(extra_params["scales"], dtype=jnp.float32).reshape(-1)
    mean = jnp.asarray(extra_params["mean"], dtype=jnp.float32).reshape(-1)
    # TODO(synk): kernel path assumes scalar scales/mean (global standardize);
    # per-channel vectors would need a channel-aligned layout instead.
    assert scales.size == 1 and mean.size == 1, "only scalar scales/mean supported"
    sm = jnp.concatenate([scales[:1], mean[:1]])  # SMEM (2,) f32

    orig_shape = outputs.shape
    total = int(outputs.size)

    # --- lane-dense 2D layout: (rows, 128); pad <=127 elems to fill last row.
    rows = pl.cdiv(total, _LANES)
    padded_total = rows * _LANES

    def to_2d(a):
        flat = a.reshape(-1)
        if padded_total != total:
            flat = jnp.pad(flat, (0, padded_total - total))
        return flat.reshape(rows, _LANES)

    x2 = to_2d(outputs)
    y2 = to_2d(targets)

    block_rows = _pick_block_rows(rows)
    grid = (pl.cdiv(rows, block_rows),)  # ragged last block handled by Pallas
    blk = pl.BlockSpec((block_rows, _LANES), lambda i: (i, 0))

    recon2, target2 = pl.pallas_call(
        _affine_kernel,
        out_shape=(
            jax.ShapeDtypeStruct((rows, _LANES), dtype),
            jax.ShapeDtypeStruct((rows, _LANES), dtype),
        ),
        grid=grid,
        in_specs=[
            pl.BlockSpec(memory_space=pltpu.MemorySpace.SMEM),  # [scale, mean]
            blk,  # outputs tile
            blk,  # targets tile
        ],
        out_specs=(blk, blk),
        compiler_params=pltpu.CompilerParams(
            dimension_semantics=("parallel",),
            vmem_limit_bytes=_VMEM_LIMIT_BYTES,
        ),
    )(sm, x2, y2)

    def from_2d(a2):
        flat = a2.reshape(-1)
        if padded_total != total:
            flat = flat[:total]
        return flat.reshape(orig_shape)

    return from_2d(recon2), from_2d(target2)


if __name__ == "__main__":
    key = jax.random.PRNGKey(0)
    k_out, k_tgt = jax.random.split(key, 2)

    # Small NCHW shapes consistent with the module's elementwise affine.
    B, C, H, W = 2, 4, 16, 16
    outputs = jax.random.normal(k_out, (B, C, H, W), dtype=jnp.float32)
    targets = jax.random.normal(k_tgt, (B, C, H, W), dtype=jnp.float32)

    extra_params = {
        "scales": jnp.float32(2.5),
        "mean": jnp.float32(0.75),
    }

    recon, target = output_standardize_transform(outputs, targets, extra_params)
    jax.block_until_ready((recon, target))

    # Reference check (pure JAX).
    ref_recon = outputs * extra_params["scales"] + extra_params["mean"]
    ref_target = targets * extra_params["scales"] + extra_params["mean"]

    assert recon.shape == (B, C, H, W) and target.shape == (B, C, H, W)
    assert jnp.allclose(recon, ref_recon)
    assert jnp.allclose(target, ref_target)

    # Also exercise a non-128-multiple / ragged-last-block shape.
    outputs2 = jax.random.normal(k_out, (3, 5, 7, 11), dtype=jnp.float32)
    targets2 = jax.random.normal(k_tgt, (3, 5, 7, 11), dtype=jnp.float32)
    r2, t2 = output_standardize_transform(outputs2, targets2, extra_params)
    jax.block_until_ready((r2, t2))
    assert jnp.allclose(r2, outputs2 * 2.5 + 0.75)
    assert jnp.allclose(t2, targets2 * 2.5 + 0.75)

    print("KERNEL_OK")
</pallas_src>

<mosaic_0001>
module attributes {stable_mosaic.version = 11 : i64} {
  func.func @_affine_kernel(%arg0: i32, %arg1: memref<2xf32, #tpu.memory_space<smem>>, %arg2: memref<8x128xf32, #tpu.memory_space<vmem>>, %arg3: memref<8x128xf32, #tpu.memory_space<vmem>>, %arg4: memref<8x128xf32, #tpu.memory_space<vmem>>, %arg5: memref<8x128xf32, #tpu.memory_space<vmem>>) attributes {dimension_semantics = [#tpu.dimension_semantics<parallel>], iteration_bounds = array<i64: 2>, scalar_prefetch = 0 : i64, scratch_operands = 0 : i64, tpu.core_type = #tpu.core_type<tc>, window_params = [{transform_indices = @transform_0, window_bounds = array<i64: 2>}, {transform_indices = @transform_1, window_bounds = array<i64: 8, 128>}, {transform_indices = @transform_2, window_bounds = array<i64: 8, 128>}, {transform_indices = @transform_3, window_bounds = array<i64: 8, 128>}, {transform_indices = @transform_4, window_bounds = array<i64: 8, 128>}]} {
    %c0 = arith.constant 0 : index
    %0 = memref.load %arg1[%c0] : memref<2xf32, #tpu.memory_space<smem>>
    %c1 = arith.constant 1 : index
    %1 = memref.load %arg1[%c1] : memref<2xf32, #tpu.memory_space<smem>>
    %c0_0 = arith.constant 0 : index
    %c0_1 = arith.constant 0 : index
    %2 = vector.load %arg2[%c0_0, %c0_1] : memref<8x128xf32, #tpu.memory_space<vmem>>, vector<8x128xf32>
    %3 = vector.broadcast %0 : f32 to vector<8x128xf32>
    %4 = arith.mulf %2, %3 : vector<8x128xf32>
    %5 = vector.broadcast %1 : f32 to vector<8x128xf32>
    %6 = arith.addf %4, %5 : vector<8x128xf32>
    %c0_2 = arith.constant 0 : index
    %c0_3 = arith.constant 0 : index
    %7 = vector.load %arg4[%c0_2, %c0_3] : memref<8x128xf32, #tpu.memory_space<vmem>>, vector<8x128xf32>
    tpu.vector_store %arg4[%c0_2, %c0_3], %6 {strides = array<i32>} : memref<8x128xf32, #tpu.memory_space<vmem>>, vector<8x128xf32>,
    %c0_4 = arith.constant 0 : index
    %c0_5 = arith.constant 0 : index
    %8 = vector.load %arg3[%c0_4, %c0_5] : memref<8x128xf32, #tpu.memory_space<vmem>>, vector<8x128xf32>
    %9 = vector.broadcast %0 : f32 to vector<8x128xf32>
    %10 = arith.mulf %8, %9 : vector<8x128xf32>
    %11 = vector.broadcast %1 : f32 to vector<8x128xf32>
    %12 = arith.addf %10, %11 : vector<8x128xf32>
    %c0_6 = arith.constant 0 : index
    %c0_7 = arith.constant 0 : index
    %13 = vector.load %arg5[%c0_6, %c0_7] : memref<8x128xf32, #tpu.memory_space<vmem>>, vector<8x128xf32>
    tpu.vector_store %arg5[%c0_6, %c0_7], %12 {strides = array<i32>} : memref<8x128xf32, #tpu.memory_space<vmem>>, vector<8x128xf32>,
    return
  }
  func.func @transform_0(%arg0: i32) -> i32 {
    %c0_i32 = arith.constant 0 : i32
    %c0_i32_0 = arith.constant 0 : i32
    return %c0_i32 : i32
  }
  func.func @transform_1(%arg0: i32) -> (i32, i32) {
    %c0_i32 = arith.constant 0 : i32
    %c0_i32_0 = arith.constant 0 : i32
    return %arg0, %c0_i32 : i32, i32
  }
  func.func @transform_2(%arg0: i32) -> (i32, i32) {
    %c0_i32 = arith.constant 0 : i32
    %c0_i32_0 = arith.constant 0 : i32
    return %arg0, %c0_i32 : i32, i32
  }
  func.func @transform_3(%arg0: i32) -> (i32, i32) {
    %c0_i32 = arith.constant 0 : i32
    %c0_i32_0 = arith.constant 0 : i32
    return %arg0, %c0_i32 : i32, i32
  }
  func.func @transform_4(%arg0: i32) -> (i32, i32) {
    %c0_i32 = arith.constant 0 : i32
    %c0_i32_0 = arith.constant 0 : i32
    return %arg0, %c0_i32 : i32, i32
  }
}

</mosaic_0001>

<bundles_post_ra>
// kernel: tpu_custom_call.1
= control target key start
LH: loop header
LB: loop body
LE: loop exit
PB: predicated region body
PF: predicated region fallthrough
CT: control target
= control target key end

     0   :  { %s958_s0 = inlined_call_operand.hbm [shape: f32[2], index: 0, kind: input, shape index: {}]   ;;  %s959_s1 = inlined_call_operand.hbm [shape: f32[16,128], index: 1, kind: input, shape index: {}]   ;;  %s960_s2 = inlined_call_operand.hbm [shape: f32[16,128], index: 2, kind: input, shape index: {}]   ;;  %s961_s3 = inlined_call_operand.hbm [shape: f32[16,128], index: 3, kind: output, shape index: {0}]   ;;  %s962_s4 = inlined_call_operand.hbm [shape: f32[16,128], index: 4, kind: output, shape index: {1}]  }
   0x1   :  { %963 = sst [smem:[#allocation18_spill]] %s958_s0 }
   0x2   :  { %10 = vsyncpa [#allocation5], 0 }
   0x3   :  { %11 = vsyncpa [#allocation3], 0 }
   0x4   :  { %13 = vsyncpa [#allocation3 + $0x1], 0 }
   0x5   :  { %14 = vsyncpa [#allocation8], 0 }
   0x6   :  { %16 = vsyncpa [#allocation8 + $0x1], 0 }
   0x7   :  { %17 = vsyncpa [#allocation4], 0 }
   0x8   :  { %19 = vsyncpa [#allocation4 + $0x1], 0 }
   0x9   :  { %20 = vsyncpa [#allocation11], 0 }
   0xa   :  { %22 = vsyncpa [#allocation11 + $0x1], 0  ;;  %s761_s15 = smov 0   ;;  %s763_s16 = smov 0  }
   0xb   :  { %s765_s17 = smov 0   ;;  %s767_s18 = smov 0  }
   0xc LB: > { %s782_s19 = sadd.s32 4294967295, %s733_s18   ;;  %s464_s20 = sadd.s32 4294967294, %s733_s18   ;;  %s733_s18 = sphi %s767_s18, %s976_s18   ;;  %s729_s17 = sphi %s765_s17, %s975_s17   ;;  %s725_s16 = sphi %s763_s16, %s974_s16   ;;  %s721_s15 = sphi %s761_s15, %s973_s15  }
   0xd   : > { %p69_p0 = scmp.ne.s32.totalorder %s725_s16, %s721_s15  ;;  %p70_p1 = scmp.eq.s32.totalorder %s782_s19, 0 }
   0xe   : > { %p119_p2 = scmp.eq.s32.totalorder %s782_s19, 1  ;;  %p125_p3 = scmp.eq.s32.totalorder %s464_s20, 1 }
   0xf   : > { %p791_p4 = por %p70_p1, %p69_p0  ;;  %p465_p5 = scmp.ge.s32.totalorder %s733_s18, 1 }
  0x10   : > { %p796_p6 = por %p125_p3, %p69_p0  ;;  %p158_p7 = scmp.lt.s32.totalorder %s733_s18, 3 }
  0x11   : > { %s966_s0 = sld [smem:[#allocation18_spill]]  ;;  %s812_s27 = sadd.s32 1, %s733_s18  }
  0x12   : > { %p804_p8 = pnand %p465_p5, %p158_p7  ;;  %s53_s28 = ssub.s32 %s733_s18, %s812_s27 }
  0x13   : > { %p54_p12 = scmp.eq.s32.totalorder %s53_s28, 0  ;;  %s56_s29 = sadd.s32 1, %s729_s17 }
  0x14   : > { %p497_p10 = pneg %p804_p8  ;;  %p63_p13 = scmp.ne.s32.totalorder %s729_s17, %s725_s16 }
  0x15   : > { %s735_s30 = smov [#allocation2]   ;;  %p64_p0 = scmp.eq.s32.totalorder %s733_s18, 0 }
  0x16   : > { %p498_p11 = pnand %p497_p10, %p70_p1  ;;  %p827_p3 = por %p119_p2, %p63_p13 }
  0x17   : > { %s170_s25 = sshll.u32 %s966_s0, 4  ;;  %p516_p5 = scmp.lt.s32.totalorder %s733_s18, 2  ;;  %s171_s25 = int_to_ptr.hbm [resolvable:$true] %s170_s25 }
  0x18   : > { %500 = dma.hbm_to_smem (!%p498_p11), %s171_s25, 16, %s735_s30, [#allocation5]  }
  0x19   : > { %s822_s5 = scalar_select %p54_p12, %s729_s17, %s56_s29  }
  0x1a   : > { %s833_s7 = sand.u32 1, %s729_s17   ;;  %p65_p7 = por %p64_p0, %p63_p13 }
  0x1b   : > { %968 = sst [smem:[#allocation17_spill]] %s822_s5  ;;  %s468_s8 = sshll.u32 %s833_s7, 3 }
  0x1c   : > { %s469_s9 = sshll.u32 %s733_s18, 3  ;;  %s185_s14 = scalar_lea.vmem [#allocation6], %s468_s8 }
  0x1d   : > { %s189_s12 = scalar_lea.hbm %s959_s1, %s469_s9  ;;  %s193_s20 = sshll.u32 %s185_s14, 4  ;;  %s194_s20 = int_to_ptr.vmem [resolvable:$true] %s193_s20 }
  0x1e   : > { %s191_s13 = sshll.u32 %s189_s12, 4  ;;  %p840_p2 = pnand %p516_p5, %p65_p7  ;;  %s192_s13 = int_to_ptr.hbm [resolvable:$true] %s191_s13 }
  0x1f   : > { %s208_s28 = scalar_lea.hbm %s960_s2, %s469_s9  ;;  %s182_s30 = scalar_lea.sflag [#allocation3], %s833_s7 }
  0x20   : > { %s210_s29 = sshll.u32 %s208_s28, 4  ;;  %s567_s0 = sshra.s32 %s192_s13, 4  ;;  %s568_s0 = int_to_ptr.hbm [resolvable:$true] %s567_s0  ;;  %s211_s29 = int_to_ptr.hbm [resolvable:$true] %s210_s29 }
  0x21   : > { %s569_s10 = scalar_lea.hbm %s568_s0, 8  ;;  %p571_p11 = pneg %p840_p2 }
  0x22   : > { %p570_p10 = scmp.ne.s32.totalorder %s568_s0, %s569_s10  ;;  %s574_s14 = scalar_lea.hbm %s959_s1, 16 }
  0x23   : > { %p575_p0 = scmp.lt.s32.totalorder %s568_s0, %s959_s1  ;;  %p576_p5 = scmp.lt.s32.totalorder %s574_s14, %s569_s10 }
  0x24   : > { %p572_p12 = pnand %p571_p11, %p570_p10 }
  0x25   : > { %p577_p7 = por %p576_p5, %p575_p0 }
  0x26   : > { %p573_p13 = pneg %p572_p12 }
  0x28   : > { %p578_p9 = pnand %p577_p7, %p573_p13 }
  0x2a   : > { %581 = shalt.err (!%p578_p9)
}
  0x2b   : > { %504 = dma.hbm_to_vmem [thread:$0]  (!%p840_p2), %s192_s13, 128, %s194_s20, %s182_s30  }
  0x2c   : > { %s204_s9 = scalar_lea.vmem [#allocation7], %s468_s8  ;;  %s201_s5 = scalar_lea.sflag [#allocation8], %s833_s7 }
  0x2d   : > { %s212_s28 = sshll.u32 %s204_s9, 4  ;;  %s597_s11 = sshra.s32 %s211_s29, 4  ;;  %s213_s28 = int_to_ptr.vmem [resolvable:$true] %s212_s28  ;;  %s598_s11 = int_to_ptr.hbm [resolvable:$true] %s597_s11 }
  0x2e   : > { %s599_s12 = scalar_lea.hbm %s598_s11, 8  ;;  %s604_s14 = scalar_lea.hbm %s960_s2, 16 }
  0x2f   : > { %p600_p10 = scmp.ne.s32.totalorder %s598_s11, %s599_s12  ;;  %p605_p9 = scmp.lt.s32.totalorder %s598_s11, %s960_s2 }
  0x30   : > { %p606_p13 = scmp.lt.s32.totalorder %s604_s14, %s599_s12 }
  0x31   : > { %p602_p12 = pnand %p600_p10, %p571_p11 }
  0x32   : > { %p607_p5 = por %p606_p13, %p605_p9 }
  0x33   : > { %p603_p0 = pneg %p602_p12 }
  0x35   : > { %p608_p7 = pnand %p607_p5, %p603_p0 }
  0x37   : > { %611 = shalt.err (!%p608_p7)
}
  0x38   : > { %507 = dma.hbm_to_vmem [thread:$0]  (!%p840_p2), %s211_s29, 128, %s213_s28, %s201_s5  }
  0x39   : > { %221 = sbr.rel (%p804_p8) target bundleno = 101 (0x65), region = 32 }
  0x3e   : > { %700 = dma.done.wait (%p70_p1), [#allocation5], 16  }
  0x3f   : > { %702 = vsyncadd (%p70_p1), [#allocation5], 4294967280  ;;  %s880_s7 = sand.u32 1, %s725_s16  }
  0x40   : > { %s883_s8 = sshll.u32 %s880_s7, 3  ;;  %s229_s13 = scalar_lea.sflag [#allocation3], %s880_s7 }
  0x41   : > { %s232_s5 = scalar_lea.vmem [#allocation6], %s883_s8 }
  0x42   : > { %704 = dma.done.wait (%p791_p4), %s229_s13, 128  }
  0x43   : > { %706 = vsyncadd (%p791_p4), %s229_s13, 4294967168  ;;  %s239_s26 = scalar_lea.sflag [#allocation8], %s880_s7  ;;  %s242_s20 = scalar_lea.vmem [#allocation7], %s883_s8 }
  0x44   : > { %708 = dma.done.wait (%p791_p4), %s239_s26, 128  }
  0x45   : > { %710 = vsyncadd (%p791_p4), %s239_s26, 4294967168 }
  0x46   : > { %248 = sfence }
  0x47   : > { %s279_s23 = sld [smem:[#allocation2]]  ;;  %v281_v0 = vld [vmem:[%s232_s5] sm:$0xff]  ;;  %s271_s30 = scalar_lea.vmem [#allocation9], %s883_s8  ;;  %v287_v1 = vld [vmem:[%s242_s20] sm:$0xff] }
  0x48   : > { %s478_s29 = sld [smem:[#allocation2 + $0x1]]  ;;  %s898_s9 = sshll.u32 %s271_s30, 4  ;;  %s310_s9 = int_to_ptr.vmem [resolvable:$true] %s898_s9 }
  0x49   : > { %s481_s28 = sshll.u32 %s782_s19, 3  ;;  %s278_s11 = scalar_lea.vmem [#allocation10], %s883_s8 }
  0x4a   : > { %s902_s12 = sshll.u32 %s278_s11, 4  ;;  %s307_s21 = scalar_lea.hbm %s961_s3, %s481_s28  ;;  %s324_s12 = int_to_ptr.vmem [resolvable:$true] %s902_s12 }
  0x4b   : > { %s311_s14 = sshll.u32 %s307_s21, 4  ;;  %s321_s13 = scalar_lea.hbm %s962_s4, %s481_s28  ;;  %s312_s14 = int_to_ptr.hbm [resolvable:$true] %s311_s14 }
  0x4c   : > { %s325_s19 = sshll.u32 %s321_s13, 4  ;;  %s292_s8 = scalar_lea.sflag [#allocation4], %s880_s7  ;;  %s912_s19 = int_to_ptr.hbm [resolvable:$true] %s325_s19 }
  0x4d   : > { %v282_v2 = vstv %s279_s23  ;;  %s641_s5 = sshra.s32 %s312_s14, 4  ;;  %s642_s5 = int_to_ptr.hbm [resolvable:$true] %s641_s5 }
  0x4e   : > { %v283_v3 = vmul.f32 %v282_v2, %v281_v0  ;;  %v284_v4 = vstv %s478_s29  ;;  %v288_v5 = vmul.f32 %v287_v1, %v282_v2  ;;  %s643_s26 = scalar_lea.hbm %s642_s5, 8  ;;  %s647_s29 = scalar_lea.hbm %s961_s3, 16 }
  0x4f   : > { %p644_p1 = scmp.ne.s32.totalorder %s642_s5, %s643_s26  ;;  %p648_p2 = scmp.lt.s32.totalorder %s642_s5, %s961_s3 }
  0x50   : > { %v285_v6 = vadd.f32 %v284_v4, %v283_v3  ;;  %v289_v7 = vadd.f32 %v288_v5, %v284_v4  ;;  %p649_p11 = scmp.lt.s32.totalorder %s647_s29, %s643_s26 }
  0x51   : > { %p645_p4 = pnand %p644_p1, %p827_p3 }
  0x52   : > { %286 = vst [vmem:[%s271_s30] sm:$0xff] %v285_v6  ;;  %p650_p10 = por %p649_p11, %p648_p2 }
  0x53   : > { %290 = vst [vmem:[%s278_s11] sm:$0xff] %v289_v7  ;;  %p646_p8 = pneg %p645_p4 }
  0x55   : > { %p651_p12 = pnand %p650_p10, %p646_p8 }
  0x57   : > { %654 = shalt.err (!%p651_p12)
}
  0x58   : > { %493 = dma.vmem_to_hbm [thread:$0]  (%p827_p3), %s310_s9, 128, %s312_s14, %s292_s8  }
  0x59   : > { %s297_s30 = scalar_lea.sflag [#allocation11], %s880_s7  ;;  %s669_s11 = sshra.s32 %s912_s19, 4  ;;  %s670_s11 = int_to_ptr.hbm [resolvable:$true] %s669_s11 }
  0x5a   : > { %s671_s10 = scalar_lea.hbm %s670_s11, 8  ;;  %s675_s25 = scalar_lea.hbm %s962_s4, 16 }
  0x5b   : > { %p672_p0 = scmp.ne.s32.totalorder %s670_s11, %s671_s10  ;;  %p676_p5 = scmp.lt.s32.totalorder %s670_s11, %s962_s4 }
  0x5c   : > { %p677_p7 = scmp.lt.s32.totalorder %s675_s25, %s671_s10 }
  0x5d   : > { %p673_p9 = pnand %p672_p0, %p827_p3 }
  0x5e   : > { %p678_p1 = por %p677_p7, %p676_p5 }
  0x5f   : > { %p674_p13 = pneg %p673_p9 }
  0x61   : > { %p679_p4 = pnand %p678_p1, %p674_p13 }
  0x63   : > { %682 = shalt.err (!%p679_p4)
}
  0x64   : > { %494 = dma.vmem_to_hbm [thread:$0]  (%p827_p3), %s324_s12, 128, %s912_s19, %s297_s30  }
  0x65 PF: > { %s337_s7 = sand.u32 1, %s721_s15   ;;  %p971_p8 = scmp.ge.s32.totalorder %s733_s18, 2 }
  0x66   : > { %s338_s9 = scalar_lea.sflag [#allocation4], %s337_s7 }
  0x67   : > { %p509_p2 = pnand %p971_p8, %p796_p6 }
  0x69   : > { %p510_p11 = pneg %p509_p2 }
  0x6b   : > { %712 = dma.done.wait (%p510_p11), %s338_s9, 128  }
  0x6c   : > { %714 = vsyncadd (%p510_p11), %s338_s9, 4294967168  ;;  %s348_s14 = scalar_lea.sflag [#allocation11], %s337_s7 }
  0x6d   : > { %716 = dma.done.wait (%p510_p11), %s348_s14, 128  }
  0x6e   : > { %718 = vsyncadd (%p510_p11), %s348_s14, 4294967168  ;;  %s972_s6 = sld [smem:[#allocation17_spill]]  ;;  %p25_p3 = scmp.ge.s32.totalorder %s812_s27, 4  }
  0x6f   : > { %s973_s15 = smov %s725_s16  ;;  %s974_s16 = smov %s729_s17 }
  0x70   : > { %s976_s18 = smov %s812_s27  ;;  %27 = sbr.rel (!%p25_p3) target bundleno = 12 (0xc), region = 112 }
  0x74   : > { %s975_s17 = smov %s972_s6 }
  0x75   :  { %354 = vsyncpa [#allocation3], 1 }
  0x76   :  { %356 = vsyncpa [#allocation3 + $0x1], 1 }
  0x77   :  { %357 = vsyncpa [#allocation8], 1 }
  0x78   :  { %359 = vsyncpa [#allocation8 + $0x1], 1 }
  0x79   :  { %360 = vsyncpa [#allocation4], 1 }
  0x7a   :  { %362 = vsyncpa [#allocation4 + $0x1], 1 }
  0x7b   :  { %363 = vsyncpa [#allocation11], 1 }
  0x7c   :  { %365 = vsyncpa [#allocation11 + $0x1], 1 }
  0x7d   :  { %366 = vsyncpa [#allocation5], 1 }
  0x7e   :  { %368 = vsyncpa [#allocation5 + $0x1], 1 }

</bundles_post_ra>
